<compile_context>
chip_gen: v7x
topology: tpu7x:2x2x1
jax: 0.10.0
libtpu: 0.0.40
codegen_flags: <defaults>
</compile_context>

<pallas_src>
import jax
import jax.numpy as jnp
from jax.experimental import pallas as pl
from jax.experimental.pallas import tpu as pltpu

IN_DIM = 28 * 28          # 784
H1, H2, OUT = 128, 64, 10
LANE = 128                # lane-dense padded width for h2 / output


def _student_mlp_kernel(x_ref, w1_ref, w2_ref, w3_ref, b_ref, o_ref):
    """Fused fc1 -> relu -> fc2 -> relu -> fc3 -> relu on one batch tile.

    x_ref : [TB, 784]  f32  (cast to bf16 in-kernel)
    w1_ref: [784, 128] bf16
    w2_ref: [128, 128] bf16 (cols 64..127 zero)
    w3_ref: [128, 128] bf16 (rows 64..127 and cols 10..127 zero)
    b_ref : [3, 128]   f32  (row0=b1, row1=b2 padded, row2=b3 padded)
    o_ref : [TB, 128]  bf16 (cols 10..127 zero; wrapper slices :10)
    """
    x = x_ref[...].astype(jnp.bfloat16)                        # VPU cast, hidden under DMA
    b1 = b_ref[0:1, :]
    b2 = b_ref[1:2, :]
    b3 = b_ref[2:3, :]

    h1 = jnp.dot(x, w1_ref[...], preferred_element_type=jnp.float32)
    h1 = jnp.maximum(h1 + b1, 0.0)                             # f32 [TB, 128]

    h2 = jnp.dot(h1.astype(jnp.bfloat16), w2_ref[...],
                 preferred_element_type=jnp.float32)
    h2 = jnp.maximum(h2 + b2, 0.0)                             # f32 [TB, 128]

    h3 = jnp.dot(h2.astype(jnp.bfloat16), w3_ref[...],
                 preferred_element_type=jnp.float32)
    h3 = jnp.maximum(h3 + b3, 0.0)                             # f32 [TB, 128]

    o_ref[...] = h3.astype(o_ref.dtype)                        # bf16 writeback


def _choose_tb(batch):
    """Batch tile: big (target 512 rows) to amortize per-step DMA overhead,
    but always >= 2 grid steps so v7x's two TensorCores both get work."""
    if batch <= 16:
        return batch                       # single full-batch block
    tb = min(512, pl.cdiv(batch, 2))
    return max(8, (tb // 8) * 8)           # sublane multiple


def student_net_forward(x, prepared, *, tb=None):
    """x: [B, 1, 28, 28] f32 (NCHW). Returns [B, 10] f32."""
    w1, w2, w3, b = prepared
    B = x.shape[0]
    x_flat = x.reshape(B, IN_DIM)          # free contiguous reshape; no cast, no pad
    if tb is None:
        tb = _choose_tb(B)
    grid = (pl.cdiv(B, tb),)               # trailing partial block: OOB rows masked

    out = pl.pallas_call(
        _student_mlp_kernel,
        out_shape=jax.ShapeDtypeStruct((B, LANE), jnp.bfloat16),
        grid=grid,
        in_specs=[
            pl.BlockSpec((tb, IN_DIM), lambda i: (i, 0)),      # x tile (pipelined)
            pl.BlockSpec((IN_DIM, H1), lambda i: (0, 0)),      # W1 resident
            pl.BlockSpec((H1, LANE),   lambda i: (0, 0)),      # W2 resident
            pl.BlockSpec((LANE, LANE), lambda i: (0, 0)),      # W3 resident
            pl.BlockSpec((3, LANE),    lambda i: (0, 0)),      # packed biases
        ],
        out_specs=pl.BlockSpec((tb, LANE), lambda i: (i, 0)),
        compiler_params=pltpu.CompilerParams(
            dimension_semantics=("parallel",)),                # v7x: shard batch axis
    )(x_flat, w1, w2, w3, b)

    # Tiny (B x 10) slice + upcast; heavy writeback above stays bf16/128-lane.
    return out[:, :OUT].astype(jnp.float32)


def init_params(key):
    """nn.Linear default init: U(-1/sqrt(fan_in), +). Weights stored [in, out]."""
    def linear(key, fan_in, fan_out):
        kw, kb = jax.random.split(key)
        bound = 1.0 / (fan_in ** 0.5)
        w = jax.random.uniform(kw, (fan_in, fan_out), jnp.float32, -bound, bound)
        bias = jax.random.uniform(kb, (fan_out,), jnp.float32, -bound, bound)
        return w, bias

    k1, k2, k3 = jax.random.split(key, 3)
    w1, b1 = linear(k1, IN_DIM, H1)
    w2, b2 = linear(k2, H1, H2)
    w3, b3 = linear(k3, H2, OUT)
    return (w1, b1, w2, b2, w3, b3)


def prepare_params(params):
    """One-time prep: zero-pad to lane-dense widths, cast weights to bf16,
    pack the three biases into a single [3, 128] f32 array."""
    w1, b1, w2, b2, w3, b3 = params

    w1_p = w1.astype(jnp.bfloat16)                                          # [784,128]
    w2_p = jnp.pad(w2, ((0, 0), (0, LANE - H2))).astype(jnp.bfloat16)       # [128,128]
    w3_p = jnp.pad(w3, ((0, LANE - H2), (0, LANE - OUT))).astype(jnp.bfloat16)  # [128,128]

    b_packed = jnp.stack([
        b1,                                    # [128]
        jnp.pad(b2, (0, LANE - H2)),           # [128]
        jnp.pad(b3, (0, LANE - OUT)),          # [128]
    ]).astype(jnp.float32)                     # [3, 128]

    return (w1_p, w2_p, w3_p, b_packed)


def reference_forward_bf16(x, prepared):
    """Plain-JAX reference mirroring the kernel's bf16/pad scheme exactly."""
    w1, w2, w3, b = prepared
    h = x.reshape(x.shape[0], -1).astype(jnp.bfloat16)
    h = jnp.maximum(jnp.dot(h, w1, preferred_element_type=jnp.float32) + b[0:1], 0.0)
    h = jnp.maximum(jnp.dot(h.astype(jnp.bfloat16), w2,
                            preferred_element_type=jnp.float32) + b[1:2], 0.0)
    h = jnp.maximum(jnp.dot(h.astype(jnp.bfloat16), w3,
                            preferred_element_type=jnp.float32) + b[2:3], 0.0)
    return h.astype(jnp.bfloat16)[:, :OUT].astype(jnp.float32)


def reference_forward_f32(x, params):
    """Plain-f32 reference of the original PyTorch forward."""
    w1, b1, w2, b2, w3, b3 = params
    h = x.reshape(x.shape[0], -1)
    h = jnp.maximum(h @ w1 + b1, 0.0)
    h = jnp.maximum(h @ w2 + b2, 0.0)
    h = jnp.maximum(h @ w3 + b3, 0.0)
    return h


if __name__ == "__main__":
    key = jax.random.PRNGKey(0)
    k_params, k_x = jax.random.split(key)

    params = init_params(k_params)
    prepared = prepare_params(params)

    # MNIST-shaped input (NCHW like PyTorch), values in [0,1).
    # B=256 -> 2 grid steps of 128 rows (exercises the batch grid).
    B = 256
    x = jax.random.uniform(k_x, (B, 1, 28, 28), jnp.float32)

    out = jax.block_until_ready(student_net_forward(x, prepared))
    assert out.shape == (B, OUT)

    # Check against the bf16/padded reference (same numerics as the kernel).
    ref_bf16 = reference_forward_bf16(x, prepared)
    assert jnp.allclose(out, ref_bf16, atol=1e-2, rtol=1e-2), \
        "mismatch vs bf16 reference"

    # Looser check against the original f32 module semantics.
    ref_f32 = reference_forward_f32(x, params)
    assert jnp.allclose(out, ref_f32, atol=5e-2, rtol=5e-2), \
        "mismatch vs f32 reference"

    # Also exercise the no-pad path (B not a multiple of the batch tile:
    # trailing partial block over-reads, OOB output rows are masked).
    B2 = 250
    x2 = x[:B2]
    out2 = jax.block_until_ready(student_net_forward(x2, prepared))
    assert out2.shape == (B2, OUT)
    assert jnp.allclose(out2, ref_bf16[:B2], atol=1e-2, rtol=1e-2), \
        "mismatch on partial-block batch"

    print("KERNEL_OK")
</pallas_src>

<mosaic_0001>
module attributes {stable_mosaic.version = 11 : i64} {
  func.func @_student_mlp_kernel(%arg0: i32, %arg1: memref<128x784xf32, #tpu.memory_space<vmem>>, %arg2: memref<784x128xbf16, #tpu.memory_space<vmem>>, %arg3: memref<128x128xbf16, #tpu.memory_space<vmem>>, %arg4: memref<128x128xbf16, #tpu.memory_space<vmem>>, %arg5: memref<3x128xf32, #tpu.memory_space<vmem>>, %arg6: memref<128x128xbf16, #tpu.memory_space<vmem>>) attributes {dimension_semantics = [#tpu.dimension_semantics<parallel>], iteration_bounds = array<i64: 2>, scalar_prefetch = 0 : i64, scratch_operands = 0 : i64, tpu.core_type = #tpu.core_type<tc>, window_params = [{transform_indices = @transform_0, window_bounds = array<i64: 128, 784>}, {pipeline_mode = #tpu.pipeline_mode<synchronous>, transform_indices = @transform_1, window_bounds = array<i64: 784, 128>}, {pipeline_mode = #tpu.pipeline_mode<synchronous>, transform_indices = @transform_2, window_bounds = array<i64: 128, 128>}, {pipeline_mode = #tpu.pipeline_mode<synchronous>, transform_indices = @transform_3, window_bounds = array<i64: 128, 128>}, {pipeline_mode = #tpu.pipeline_mode<synchronous>, transform_indices = @transform_4, window_bounds = array<i64: 3, 128>}, {transform_indices = @transform_5, window_bounds = array<i64: 128, 128>}]} {
    %c0 = arith.constant 0 : index
    %c0_0 = arith.constant 0 : index
    %0 = vector.load %arg1[%c0, %c0_0] : memref<128x784xf32, #tpu.memory_space<vmem>>, vector<128x784xf32>
    %1 = arith.truncf %0 : vector<128x784xf32> to vector<128x784xbf16>
    %c0_1 = arith.constant 0 : index
    %c0_2 = arith.constant 0 : index
    %2 = vector.load %arg5[%c0_1, %c0_2] : memref<3x128xf32, #tpu.memory_space<vmem>>, vector<1x128xf32>
    %c1 = arith.constant 1 : index
    %c0_3 = arith.constant 0 : index
    %3 = vector.load %arg5[%c1, %c0_3] : memref<3x128xf32, #tpu.memory_space<vmem>>, vector<1x128xf32>
    %c2 = arith.constant 2 : index
    %c0_4 = arith.constant 0 : index
    %4 = vector.load %arg5[%c2, %c0_4] : memref<3x128xf32, #tpu.memory_space<vmem>>, vector<1x128xf32>
    %c0_5 = arith.constant 0 : index
    %c0_6 = arith.constant 0 : index
    %5 = vector.load %arg2[%c0_5, %c0_6] : memref<784x128xbf16, #tpu.memory_space<vmem>>, vector<784x128xbf16>
    %cst = arith.constant dense<0.000000e+00> : vector<128x128xf32>
    %6 = tpu.matmul %1, %5, %cst {dimension_numbers = #tpu.dot_dimension_numbers<[1], [0], [0], [1], [0, 0, 1, 1], [], []>} : vector<128x784xbf16>, vector<784x128xbf16>, vector<128x128xf32> -> vector<128x128xf32>
    %7 = vector.broadcast %2 : vector<1x128xf32> to vector<128x128xf32>
    %8 = arith.addf %6, %7 : vector<128x128xf32>
    %cst_7 = arith.constant 0.000000e+00 : f32
    %9 = vector.broadcast %cst_7 : f32 to vector<128x128xf32>
    %10 = arith.maximumf %8, %9 : vector<128x128xf32>
    %11 = arith.truncf %10 : vector<128x128xf32> to vector<128x128xbf16>
    %c0_8 = arith.constant 0 : index
    %c0_9 = arith.constant 0 : index
    %12 = vector.load %arg3[%c0_8, %c0_9] : memref<128x128xbf16, #tpu.memory_space<vmem>>, vector<128x128xbf16>
    %cst_10 = arith.constant dense<0.000000e+00> : vector<128x128xf32>
    %13 = tpu.matmul %11, %12, %cst_10 {dimension_numbers = #tpu.dot_dimension_numbers<[1], [0], [0], [1], [0, 0, 1, 1], [], []>} : vector<128x128xbf16>, vector<128x128xbf16>, vector<128x128xf32> -> vector<128x128xf32>
    %14 = vector.broadcast %3 : vector<1x128xf32> to vector<128x128xf32>
    %15 = arith.addf %13, %14 : vector<128x128xf32>
    %cst_11 = arith.constant 0.000000e+00 : f32
    %16 = vector.broadcast %cst_11 : f32 to vector<128x128xf32>
    %17 = arith.maximumf %15, %16 : vector<128x128xf32>
    %18 = arith.truncf %17 : vector<128x128xf32> to vector<128x128xbf16>
    %c0_12 = arith.constant 0 : index
    %c0_13 = arith.constant 0 : index
    %19 = vector.load %arg4[%c0_12, %c0_13] : memref<128x128xbf16, #tpu.memory_space<vmem>>, vector<128x128xbf16>
    %cst_14 = arith.constant dense<0.000000e+00> : vector<128x128xf32>
    %20 = tpu.matmul %18, %19, %cst_14 {dimension_numbers = #tpu.dot_dimension_numbers<[1], [0], [0], [1], [0, 0, 1, 1], [], []>} : vector<128x128xbf16>, vector<128x128xbf16>, vector<128x128xf32> -> vector<128x128xf32>
    %21 = vector.broadcast %4 : vector<1x128xf32> to vector<128x128xf32>
    %22 = arith.addf %20, %21 : vector<128x128xf32>
    %cst_15 = arith.constant 0.000000e+00 : f32
    %23 = vector.broadcast %cst_15 : f32 to vector<128x128xf32>
    %24 = arith.maximumf %22, %23 : vector<128x128xf32>
    %25 = arith.truncf %24 : vector<128x128xf32> to vector<128x128xbf16>
    %c0_16 = arith.constant 0 : index
    %c0_17 = arith.constant 0 : index
    %26 = vector.load %arg6[%c0_16, %c0_17] : memref<128x128xbf16, #tpu.memory_space<vmem>>, vector<128x128xbf16>
    tpu.vector_store %arg6[%c0_16, %c0_17], %25 {strides = array<i32>} : memref<128x128xbf16, #tpu.memory_space<vmem>>, vector<128x128xbf16>,
    return
  }
  func.func @transform_0(%arg0: i32) -> (i32, i32) {
    %c0_i32 = arith.constant 0 : i32
    %c0_i32_0 = arith.constant 0 : i32
    return %arg0, %c0_i32 : i32, i32
  }
  func.func @transform_1(%arg0: i32) -> (i32, i32) {
    %c0_i32 = arith.constant 0 : i32
    %c0_i32_0 = arith.constant 0 : i32
    %c0_i32_1 = arith.constant 0 : i32
    return %c0_i32, %c0_i32_0 : i32, i32
  }
  func.func @transform_2(%arg0: i32) -> (i32, i32) {
    %c0_i32 = arith.constant 0 : i32
    %c0_i32_0 = arith.constant 0 : i32
    %c0_i32_1 = arith.constant 0 : i32
    return %c0_i32, %c0_i32_0 : i32, i32
  }
  func.func @transform_3(%arg0: i32) -> (i32, i32) {
    %c0_i32 = arith.constant 0 : i32
    %c0_i32_0 = arith.constant 0 : i32
    %c0_i32_1 = arith.constant 0 : i32
    return %c0_i32, %c0_i32_0 : i32, i32
  }
  func.func @transform_4(%arg0: i32) -> (i32, i32) {
    %c0_i32 = arith.constant 0 : i32
    %c0_i32_0 = arith.constant 0 : i32
    %c0_i32_1 = arith.constant 0 : i32
    return %c0_i32, %c0_i32_0 : i32, i32
  }
  func.func @transform_5(%arg0: i32) -> (i32, i32) {
    %c0_i32 = arith.constant 0 : i32
    %c0_i32_0 = arith.constant 0 : i32
    return %arg0, %c0_i32 : i32, i32
  }
}

</mosaic_0001>

<bundles_post_ra>
// kernel: tpu_custom_call.1
= control target key start
LH: loop header
LB: loop body
LE: loop exit
PB: predicated region body
PF: predicated region fallthrough
CT: control target
= control target key end

     0   :  { %10 = vsyncpa [#allocation3], 0  ;;  %s2972_s0 = inlined_call_operand.vmem [shape: f32[256,784], index: 0, kind: input, shape index: {}]   ;;  %s2973_s1 = inlined_call_operand.vmem [shape: bf16[784,128], index: 1, kind: input, shape index: {}]   ;;  %s2974_s2 = inlined_call_operand.vmem [shape: bf16[128,128], index: 2, kind: input, shape index: {}]   ;;  %s2975_s3 = inlined_call_operand.vmem [shape: bf16[128,128], index: 3, kind: input, shape index: {}]   ;;  %s2976_s4 = inlined_call_operand.vmem [shape: f32[3,128], index: 4, kind: input, shape index: {}]   ;;  %s2977_s5 = inlined_call_operand.hbm [shape: bf16[256,128], index: 5, kind: output, shape index: {}]  }
   0x1   :  { %12 = vsyncpa [#allocation3 + $0x1], 0  ;;  %s2463_s18 = smov 0   ;;  %s2465_s19 = smov 0  }
   0x2   :  { %s2467_s20 = smov 0   ;;  %s2469_s21 = smov 0  }
   0x3 LB: > { %s2484_s22 = sadd.s32 4294967295, %s2428_s21   ;;  %s1760_s23 = sadd.s32 4294967294, %s2428_s21   ;;  %s2428_s21 = sphi %s2469_s21, %s2983_s21   ;;  %s2424_s20 = sphi %s2467_s20, %s2982_s20   ;;  %s2420_s19 = sphi %s2465_s19, %s2981_s19   ;;  %s2416_s18 = sphi %s2463_s18, %s2980_s18  }
   0x4   : > { %s2488_s24 = sadd.s32 1, %s2428_s21   ;;  %s135_s25 = sadd.s32 1, %s2424_s20 }
   0x5   : > { %s132_s26 = ssub.s32 %s2428_s21, %s2488_s24  ;;  %p145_p0 = scmp.ne.s32.totalorder %s2424_s20, %s2420_s19 }
   0x6   : > { %p133_p1 = scmp.eq.s32.totalorder %s132_s26, 0  ;;  %p146_p2 = scmp.eq.s32.totalorder %s2484_s22, 1 }
   0x7   : > { %p151_p3 = scmp.ne.s32.totalorder %s2420_s19, %s2416_s18  ;;  %p152_p4 = scmp.eq.s32.totalorder %s1760_s23, 1 }
   0x8   : > { %s2499_s27 = scalar_select %p133_p1, %s2424_s20, %s135_s25  }
   0x9   : > { %p2501_p5 = por %p146_p2, %p145_p0  ;;  %p2505_p6 = por %p152_p4, %p151_p3 }
   0xa   : > { %p1763_p7 = scmp.ge.s32.totalorder %s2428_s21, 1  ;;  %p192_p8 = scmp.lt.s32.totalorder %s2428_s21, 3 }
   0xc   : > { %p193_p9 = pnand %p1763_p7, %p192_p8 }
   0xd   : > { %v2301_v0 = vld [vmem:[%s2973_s1 + $0x40] sm:$0xff] (!%p193_p9)   ;;  %v2305_v4 = vld [vmem:[%s2973_s1 + $0x48] sm:$0xff] (!%p193_p9)   ;;  %v2309_v8 = vld [vmem:[%s2973_s1 + $0x50] sm:$0xff] (!%p193_p9)   ;;  %s1765_s25 = sshll.u32 (!%p193_p9), %s2484_s22, 4  ;;  %vm797_vm0 = vcmask (!%p193_p9), 130048   ;;  %s1880_s8 = sshll.u32 (!%p193_p9), %s2484_s22, 10 }
   0xe   : > { %196 = sbr.rel (%p193_p9) target bundleno = 842 (0x34a), region = 40  ;;  %v2302_v1 = vld [vmem:[%s2973_s1 + $0xc0] sm:$0xff] (!%p193_p9)   ;;  %1928 = vmatprep.subr.bf16.mxu0 (!%p193_p9), %v2301_v0  ;;  %v2306_v5 = vld [vmem:[%s2973_s1 + $0xc8] sm:$0xff] (!%p193_p9)   ;;  %v2310_v9 = vld [vmem:[%s2973_s1 + $0xd0] sm:$0xff] (!%p193_p9)   ;;  %p222_p10 = scmp.lt.s32.totalorder (!%p193_p9), %s1765_s25, 31 }
   0xf   : > { %v2303_v2 = vld [vmem:[%s2973_s1] sm:$0xff] (!%p193_p9)   ;;  %1992 = vmatprep.subr.bf16.mxu1 (!%p193_p9), %v2302_v1  ;;  %v2307_v6 = vld [vmem:[%s2973_s1 + $0x8] sm:$0xff] (!%p193_p9)   ;;  %v2311_v10 = vld [vmem:[%s2973_s1 + $0x10] sm:$0xff] (!%p193_p9)   ;;  %s2923_s12 = scalar_lea.hbm (!%p193_p9), %s2977_s5, %s1880_s8  ;;  %s2430_s14 = smov (!%p193_p9), [#allocation2]  }
  0x10   : > { %v2304_v3 = vld [vmem:[%s2973_s1 + $0x80] sm:$0xff] (!%p193_p9)   ;;  %1929 = vmatpush3.bf16.msra.mxu0 (!%p193_p9), %v2303_v2  ;;  %v2308_v7 = vld [vmem:[%s2973_s1 + $0x88] sm:$0xff] (!%p193_p9)   ;;  %v2312_v11 = vld [vmem:[%s2973_s1 + $0x90] sm:$0xff] (!%p193_p9)   ;;  %s2370_s15 = sshll.u32 (!%p193_p9), %s2430_s14, 4  ;;  %s2371_s15 = int_to_ptr.vmem [resolvable:$false] %s2370_s15 }
  0x11   : > { %1993 = vmatpush3.bf16.msra.mxu1 (!%p193_p9), %v2304_v3  ;;  %1930 = vmatprep.subr.bf16.mxu0 (!%p193_p9), %v2305_v4  ;;  %v2313_v12 = vld [vmem:[%s2973_s1 + $0x58] sm:$0xff] (!%p193_p9)   ;;  %v2317_v16 = vld [vmem:[%s2973_s1 + $0x60] sm:$0xff] (!%p193_p9)   ;;  %v2321_v20 = vld [vmem:[%s2973_s1 + $0x68] sm:$0xff] (!%p193_p9)   ;;  %s2372_s16 = scalar_lea.vmem (!%p193_p9), %s2371_s15, 2048 }
  0x12   : > { %1994 = vmatprep.subr.bf16.mxu1 (!%p193_p9), %v2306_v5  ;;  %v2314_v13 = vld [vmem:[%s2973_s1 + $0xd8] sm:$0xff] (!%p193_p9)   ;;  %v2318_v17 = vld [vmem:[%s2973_s1 + $0xe0] sm:$0xff] (!%p193_p9)   ;;  %v2322_v21 = vld [vmem:[%s2973_s1 + $0xe8] sm:$0xff] (!%p193_p9)  }
  0x13   : > { %v2315_v14 = vld [vmem:[%s2973_s1 + $0x18] sm:$0xff] (!%p193_p9)   ;;  %v2319_v18 = vld [vmem:[%s2973_s1 + $0x20] sm:$0xff] (!%p193_p9)   ;;  %v2323_v22 = vld [vmem:[%s2973_s1 + $0x28] sm:$0xff] (!%p193_p9)  }
  0x14   : > { %1931 = vmatpush3.bf16.msra.mxu0 (!%p193_p9), %v2307_v6  ;;  %v2316_v15 = vld [vmem:[%s2973_s1 + $0x98] sm:$0xff] (!%p193_p9)   ;;  %v2320_v19 = vld [vmem:[%s2973_s1 + $0xa0] sm:$0xff] (!%p193_p9)   ;;  %v2324_v23 = vld [vmem:[%s2973_s1 + $0xa8] sm:$0xff] (!%p193_p9)  }
  0x15   : > { %1995 = vmatpush3.bf16.msra.mxu1 %v2308_v7  ;;  %1932 = vmatprep.subr.bf16.mxu0 %v2309_v8  ;;  %s2985_s25 = smov (!%p222_p10, %s1765_s25), 31  ;;  %v2325_v24 = vld [vmem:[%s2973_s1 + $0x70] sm:$0xff]   ;;  %v2329_v28 = vld [vmem:[%s2973_s1 + $0x78] sm:$0xff]   ;;  %v2333_v44 = vld [vmem:[%s2973_s1 + $0x140] sm:$0xff]  }
  0x16   : > { %1996 = vmatprep.subr.bf16.mxu1 %v2310_v9  ;;  %v2326_v25 = vld [vmem:[%s2973_s1 + $0xf0] sm:$0xff]   ;;  %s2259_s11 = smul.u32 56, %s2985_s25  ;;  %v2330_v29 = vld [vmem:[%s2973_s1 + $0xf8] sm:$0xff]   ;;  %v2334_v45 = vld [vmem:[%s2973_s1 + $0x100] sm:$0xff]  }
  0x17   : > { %v2327_v26 = vld [vmem:[%s2973_s1 + $0x30] sm:$0xff]   ;;  %v2331_v30 = vld [vmem:[%s2973_s1 + $0x38] sm:$0xff]   ;;  %v2335_v57 = vld [vmem:[%s2973_s1 + $0x148] sm:$0xff]  }
  0x18   : > { %1933 = vmatpush3.bf16.msra.mxu0 %v2311_v10  ;;  %v2328_v27 = vld [vmem:[%s2973_s1 + $0xb0] sm:$0xff]   ;;  %s2605_s6 = scalar_lea.vmem %s2972_s0, %s2259_s11  ;;  %v2332_v31 = vld [vmem:[%s2973_s1 + $0xb8] sm:$0xff]   ;;  %v2336_v59 = vld [vmem:[%s2973_s1 + $0x108] sm:$0xff]  }
  0x19   : > { %1997 = vmatpush3.bf16.msra.mxu1 %v2312_v11  ;;  %1934 = vmatprep.subr.bf16.mxu0 %v2313_v12  ;;  %v231_v32 = vld [vmem:[%s2605_s6 + $0x8] sm:$0xff]  ;;  %v238_v33 = vld [vmem:[%s2605_s6 + $0x40] sm:$0xff]  ;;  %v233_v34 = vld [vmem:[%s2605_s6 + $0x18] sm:$0xff] }
  0x1a   : > { %1998 = vmatprep.subr.bf16.mxu1 %v2314_v13  ;;  %v343_v35 = vpack.c.bf16 %v238_v33, %v231_v32  ;;  %v240_v36 = vld [vmem:[%s2605_s6 + $0x50] sm:$0xff]  ;;  %v230_v37 = vld [vmem:[%s2605_s6] sm:$0xff]  ;;  %v237_v38 = vld [vmem:[%s2605_s6 + $0x38] sm:$0xff] }
  0x1b   : > { %v345_v39 = vpack.c.bf16 %v240_v36, %v233_v34  ;;  %v342_v40 = vpack.c.bf16 %v237_v38, %v230_v37  ;;  %v232_v41 = vld [vmem:[%s2605_s6 + $0x10] sm:$0xff]  ;;  %v239_v42 = vld [vmem:[%s2605_s6 + $0x48] sm:$0xff]  ;;  %v245_v46 = vld [vmem:[%s2605_s6 + $0x78] sm:$0xff] }
  0x1c   : > { %1935 = vmatpush3.bf16.msra.mxu0 %v2315_v14  ;;  %854 = vmatprep.mubr.bf16.mxu0 %v343_v35  ;;  %v344_v43 = vpack.c.bf16 %v239_v42, %v232_v41  ;;  %v252_v47 = vld [vmem:[%s2605_s6 + $0xb0] sm:$0xff]  ;;  %v247_v48 = vld [vmem:[%s2605_s6 + $0x88] sm:$0xff]  ;;  %v254_v49 = vld [vmem:[%s2605_s6 + $0xc0] sm:$0xff] }
  0x1d   : > { %1999 = vmatpush3.bf16.msra.mxu1 %v2316_v15  ;;  %1936 = vmatprep.subr.bf16.mxu0 %v2317_v16  ;;  %v350_v50 = vpack.c.bf16 %v252_v47, %v245_v46  ;;  %v352_v51 = vpack.c.bf16 %v254_v49, %v247_v48  ;;  %v244_v52 = vld [vmem:[%s2605_s6 + $0x70] sm:$0xff]  ;;  %v251_v53 = vld [vmem:[%s2605_s6 + $0xa8] sm:$0xff]  ;;  %v246_v54 = vld [vmem:[%s2605_s6 + $0x80] sm:$0xff] }
  0x1e   : > { %2000 = vmatprep.subr.bf16.mxu1 %v2318_v17  ;;  %951 = vmatprep.mubr.bf16.mxu1 %v345_v39  ;;  %v253_v55 = vld [vmem:[%s2605_s6 + $0xb8] sm:$0xff]  ;;  %v349_v56 = vpack.c.bf16 %v251_v53, %v244_v52  ;;  %v259_v60 = vld [vmem:[%s2605_s6 + $0xe8] sm:$0xff]  ;;  %v266_v61 = vld [vmem:[%s2605_s6 + $0x120] sm:$0xff] }
  0x1f   : > { %v351_v58 = vpack.c.bf16 %v253_v55, %v246_v54  ;;  %v357_v62 = vpack.c.bf16 %v266_v61, %v259_v60  ;;  %v261_v63 = vld [vmem:[%s2605_s6 + $0xf8] sm:$0xff]  ;;  %v268_v0 = vld [vmem:[%s2605_s6 + $0x130] sm:$0xff]  ;;  %v258_v2 = vld [vmem:[%s2605_s6 + $0xe0] sm:$0xff] }
  0x20   : > { %1937 = vmatpush3.bf16.msra.mxu0 %v2319_v18  ;;  %v359_v1 = vpack.c.bf16 %v268_v0, %v261_v63  ;;  %v265_v3 = vld [vmem:[%s2605_s6 + $0x118] sm:$0xff]  ;;  %v260_v4 = vld [vmem:[%s2605_s6 + $0xf0] sm:$0xff]  ;;  %v267_v7 = vld [vmem:[%s2605_s6 + $0x128] sm:$0xff] }
  0x21   : > { %2001 = vmatpush3.bf16.msra.mxu1 %v2320_v19  ;;  %1938 = vmatprep.subr.bf16.mxu0 %v2321_v20  ;;  %v2337_v5 = vld [vmem:[%s2973_s1 + $0x150] sm:$0xff]   ;;  %v273_v8 = vld [vmem:[%s2605_s6 + $0x158] sm:$0xff]  ;;  %v275_v10 = vld [vmem:[%s2605_s6 + $0x168] sm:$0xff]  ;;  %v356_v12 = vpack.c.bf16 %v265_v3, %v258_v2  ;;  %v358_v13 = vpack.c.bf16 %v267_v7, %v260_v4 }
  0x22   : > { %2002 = vmatprep.subr.bf16.mxu1 %v2322_v21  ;;  %v2338_v6 = vld [vmem:[%s2973_s1 + $0x110] sm:$0xff]   ;;  %v282_v11 = vld [vmem:[%s2605_s6 + $0x1a0] sm:$0xff]  ;;  %v2339_v15 = vld [vmem:[%s2973_s1 + $0x158] sm:$0xff]  }
  0x23   : > { %v280_v9 = vld [vmem:[%s2605_s6 + $0x190] sm:$0xff]  ;;  %v366_v16 = vpack.c.bf16 %v282_v11, %v275_v10  ;;  %v2340_v17 = vld [vmem:[%s2973_s1 + $0x118] sm:$0xff]   ;;  %v279_v19 = vld [vmem:[%s2605_s6 + $0x188] sm:$0xff] }
  0x24   : > { %1939 = vmatpush3.bf16.msra.mxu0 %v2323_v22  ;;  %v364_v14 = vpack.c.bf16 %v280_v9, %v273_v8  ;;  %v272_v18 = vld [vmem:[%s2605_s6 + $0x150] sm:$0xff]  ;;  %v274_v20 = vld [vmem:[%s2605_s6 + $0x160] sm:$0xff]  ;;  %v281_v21 = vld [vmem:[%s2605_s6 + $0x198] sm:$0xff] }
  0x25   : > { %2003 = vmatpush3.bf16.msra.mxu1 %v2324_v23  ;;  %1940 = vmatprep.subr.bf16.mxu0 %v2325_v24  ;;  %v287_v22 = vld [vmem:[%s2605_s6 + $0x1c8] sm:$0xff]  ;;  %v294_v23 = vld [vmem:[%s2605_s6 + $0x200] sm:$0xff]  ;;  %v293_v35 = vld [vmem:[%s2605_s6 + $0x1f8] sm:$0xff] }
  0x26   : > { %2004 = vmatprep.subr.bf16.mxu1 %v2326_v25  ;;  %v2341_v24 = vld [vmem:[%s2973_s1 + $0x160] sm:$0xff]   ;;  %v289_v25 = vld [vmem:[%s2605_s6 + $0x1d8] sm:$0xff]  ;;  %v2343_v32 = vld [vmem:[%s2973_s1 + $0x168] sm:$0xff]  }
  0x27   : > { %v2344_v33 = vld [vmem:[%s2973_s1 + $0x128] sm:$0xff]   ;;  %v286_v34 = vld [vmem:[%s2605_s6 + $0x1c0] sm:$0xff]  ;;  %v288_v36 = vld [vmem:[%s2605_s6 + $0x1d0] sm:$0xff] }
  0x28   : > { %1941 = vmatpush3.bf16.msra.mxu0 %v2327_v26  ;;  %v296_v26 = vld [vmem:[%s2605_s6 + $0x210] sm:$0xff]  ;;  %v295_v37 = vld [vmem:[%s2605_s6 + $0x208] sm:$0xff]  ;;  %v301_v38 = vld [vmem:[%s2605_s6 + $0x238] sm:$0xff] }
  0x29   : > { %2005 = vmatpush3.bf16.msra.mxu1 %v2328_v27  ;;  %1942 = vmatprep.subr.bf16.mxu0 %v2329_v28  ;;  %v2342_v27 = vld [vmem:[%s2973_s1 + $0x120] sm:$0xff]   ;;  %v363_v28 = vpack.c.bf16 %v279_v19, %v272_v18  ;;  %v308_v39 = vld [vmem:[%s2605_s6 + $0x270] sm:$0xff]  ;;  %v2347_v49 = vld [vmem:[%s2973_s1 + $0x178] sm:$0xff]  }
  0x2a   : > { %2006 = vmatprep.subr.bf16.mxu1 %v2330_v29  ;;  %v365_v29 = vpack.c.bf16 %v281_v21, %v274_v20  ;;  %v310_v41 = vld [vmem:[%s2605_s6 + $0x280] sm:$0xff]  ;;  %v2345_v42 = vld [vmem:[%s2973_s1 + $0x170] sm:$0xff]   ;;  %v378_v46 = vpack.c.bf16 %v308_v39, %v301_v38  ;;  %v2348_v52 = vld [vmem:[%s2973_s1 + $0x138] sm:$0xff]  }
  0x2b   : > { %v300_v48 = vld [vmem:[%s2605_s6 + $0x230] sm:$0xff]  ;;  %v309_v53 = vld [vmem:[%s2605_s6 + $0x278] sm:$0xff]  ;;  %v315_v54 = vld [vmem:[%s2605_s6 + $0x2a8] sm:$0xff] }
  0x2c   : > { %1943 = vmatpush3.bf16.msra.mxu0 %v2331_v30  ;;  %v371_v30 = vpack.c.bf16 %v294_v23, %v287_v22  ;;  %v322_v55 = vld [vmem:[%s2605_s6 + $0x2e0] sm:$0xff]  ;;  %v321_v0 = vld [vmem:[%s2605_s6 + $0x2d8] sm:$0xff]  ;;  %v323_v2 = vld [vmem:[%s2605_s6 + $0x2e8] sm:$0xff] }
  0x2d   : > { %2007 = vmatpush3.bf16.msra.mxu1 %v2332_v31  ;;  %2056 = vmatprep.subr.bf16.mxu0 %v2333_v44  ;;  %v373_v31 = vpack.c.bf16 %v296_v26, %v289_v25  ;;  %v385_v60 = vpack.c.bf16 %v322_v55, %v315_v54  ;;  %v314_v63 = vld [vmem:[%s2605_s6 + $0x2a0] sm:$0xff]  ;;  %v329_v3 = vld [vmem:[%s2605_s6 + $0x318] sm:$0xff]  ;;  %v336_v4 = vld [vmem:[%s2605_s6 + $0x350] sm:$0xff] }
  0x2e   : > { %2243 = vmatprep.subr.bf16.mxu1 %v2333_v44  ;;  %v2346_v44 = vld [vmem:[%s2973_s1 + $0x130] sm:$0xff]   ;;  %v384_v7 = vpack.c.bf16 %v321_v0, %v314_v63  ;;  %v392_v9 = vpack.c.bf16 %v336_v4, %v329_v3  ;;  %v326_v18 = vld [vmem:[%s2605_s6 + $0x300] sm:$0xff]  ;;  %v325_v26 = vld [vmem:[%s2605_s6 + $0x2f8] sm:$0xff] }
  0x2f   : > { %855 = vmatmul.mubr.bf16.vlgmr.msra.gmra.mrb[0].mxu0 %v342_v40  ;;  %v303_v40 = vld [vmem:[%s2605_s6 + $0x248] sm:$0xff]  ;;  %v328_v11 = vld [vmem:[%s2605_s6 + $0x310] sm:$0xff]  ;;  %v234_v23 = vld [vmem:[%s2605_s6 + $0x20] sm:$0xff] }
  0x30   : > { %952 = vmatmul.mubr.bf16.vlgmr.msra.gmra.mrb[0].mxu1 %v344_v43  ;;  %2057 = vmatpush3.bf16.msra.mxu0 %v2334_v45  ;;  %v370_v43 = vpack.c.bf16 %v293_v35, %v286_v34  ;;  %v380_v47 = vpack.c.bf16 %v310_v41, %v303_v40  ;;  %v318_v25 = vld [vmem:[%s2605_s6 + $0x2c0] sm:$0xff]  ;;  %v248_v35 = vld [vmem:[%s2605_s6 + $0x90] sm:$0xff]  ;;  %v339_v38 = vld [vmem:[%s2605_s6 + $0x368] sm:$0xff] }
  0x31   : > { %2251 = vmatpush3.bf16.msra.mxu1 %v2334_v45  ;;  %862 = vmatprep.mubr.bf16.mxu0 %v350_v50  ;;  %v372_v45 = vpack.c.bf16 %v295_v37, %v288_v36  ;;  %v307_v50 = vld [vmem:[%s2605_s6 + $0x268] sm:$0xff]  ;;  %v332_v37 = vld [vmem:[%s2605_s6 + $0x330] sm:$0xff]  ;;  %v270_v40 = vld [vmem:[%s2605_s6 + $0x140] sm:$0xff] }
  0x32   : > { %959 = vmatprep.mubr.bf16.mxu1 %v352_v51  ;;  %2058 = vmatprep.subr.bf16.mxu0 %v2335_v57  ;;  %v302_v51 = vld [vmem:[%s2605_s6 + $0x240] sm:$0xff]  ;;  %v255_v36 = vld [vmem:[%s2605_s6 + $0xc8] sm:$0xff]  ;;  %v236_v41 = vld [vmem:[%s2605_s6 + $0x30] sm:$0xff] }
  0x33   : > { %2244 = vmatprep.subr.bf16.mxu1 %v2335_v57  ;;  %v324_v57 = vld [vmem:[%s2605_s6 + $0x2f0] sm:$0xff]  ;;  %v263_v39 = vld [vmem:[%s2605_s6 + $0x108] sm:$0xff]  ;;  %v298_v0 = vld [vmem:[%s2605_s6 + $0x220] sm:$0xff] }
  0x34   : > { %2059 = vmatpush3.bf16.msra.mxu0 %v2336_v59  ;;  %v271_v54 = vld [vmem:[%s2605_s6 + $0x148] sm:$0xff] }
  0x35   : > { %2252 = vmatpush3.bf16.msra.mxu1 %v2336_v59  ;;  %2060 = vmatprep.subr.bf16.mxu0 %v2337_v5  ;;  %v379_v59 = vpack.c.bf16 %v309_v53, %v302_v51  ;;  %v277_v51 = vld [vmem:[%s2605_s6 + $0x178] sm:$0xff]  ;;  %v264_v53 = vld [vmem:[%s2605_s6 + $0x110] sm:$0xff]  ;;  %v291_v63 = vld [vmem:[%s2605_s6 + $0x1e8] sm:$0xff] }
  0x36   : > { %2245 = vmatprep.subr.bf16.mxu1 %v2337_v5  ;;  %v331_v5 = vld [vmem:[%s2605_s6 + $0x328] sm:$0xff] }
  0x37   : > { %863 = vmatmul.mubr.bf16.gmra.mrb[4].mxu0 %v349_v56  ;;  %v317_v56 = vld [vmem:[%s2605_s6 + $0x2b8] sm:$0xff] }
  0x38   : > { %960 = vmatmul.mubr.bf16.gmra.mrb[4].mxu1 %v351_v58  ;;  %870 = vmatprep.mubr.bf16.mxu0 %v357_v62  ;;  %v377_v58 = vpack.c.bf16 %v307_v50, %v300_v48  ;;  %v387_v61 = vpack.c.bf16 %v324_v57, %v317_v56  ;;  %v2349_v62 = vld [vmem:[%s2973_s1 + $0x180] sm:$0xff]   ;;  %v269_v48 = vld [vmem:[%s2605_s6 + $0x138] sm:$0xff] }
  0x39   : > { %967 = vmatprep.mubr.bf16.mxu1 %v359_v1  ;;  %2061 = vmatpush3.bf16.msra.mxu0 %v2338_v6  ;;  %v316_v1 = vld [vmem:[%s2605_s6 + $0x2b0] sm:$0xff]  ;;  %v257_v50 = vld [vmem:[%s2605_s6 + $0xd8] sm:$0xff] }
  0x3a   : > { %2253 = vmatpush3.bf16.msra.mxu1 %v2338_v6  ;;  %2062 = vmatprep.subr.bf16.mxu0 %v2339_v15  ;;  %v338_v6 = vld [vmem:[%s2605_s6 + $0x360] sm:$0xff]  ;;  %v386_v8 = vpack.c.bf16 %v323_v2, %v316_v1  ;;  %v292_v1 = vld [vmem:[%s2605_s6 + $0x1f0] sm:$0xff]  ;;  %v299_v2 = vld [vmem:[%s2605_s6 + $0x228] sm:$0xff] }
  0x3b   : > { %2246 = vmatprep.subr.bf16.mxu1 %v2339_v15  ;;  %v394_v10 = vpack.c.bf16 %v338_v6, %v331_v5  ;;  %v235_v15 = vld [vmem:[%s2605_s6 + $0x28] sm:$0xff]  ;;  %v375_v5 = vpack.c.bf16 %v298_v0, %v291_v63  ;;  %v376_v6 = vpack.c.bf16 %v299_v2, %v292_v1  ;;  %v2362_v63 = vld [vmem:[%s2975_s3 + $0x20] sm:$0xff]  }
  0x3d   : > { %2063 = vmatpush3.bf16.msra.mxu0 %v2340_v17 }
  0x3e   : > { %2254 = vmatpush3.bf16.msra.mxu1 %v2340_v17  ;;  %2064 = vmatprep.subr.bf16.mxu0 %v2341_v24  ;;  %v319_v17 = vld [vmem:[%s2605_s6 + $0x2c8] sm:$0xff] }
  0x3f   : > { %871 = vmatmul.mubr.bf16.gmra.mrb[8].mxu0 %v356_v12  ;;  %2247 = vmatprep.subr.bf16.mxu1 %v2341_v24  ;;  %v335_v12 = vld [vmem:[%s2605_s6 + $0x348] sm:$0xff]  ;;  %v389_v22 = vpack.c.bf16 %v326_v18, %v319_v17  ;;  %v241_v24 = vld [vmem:[%s2605_s6 + $0x58] sm:$0xff] }
  0x40   : > { %968 = vmatmul.mubr.bf16.gmra.mrb[8].mxu1 %v358_v13  ;;  %878 = vmatprep.mubr.bf16.mxu0 %v364_v14  ;;  %v330_v13 = vld [vmem:[%s2605_s6 + $0x320] sm:$0xff]  ;;  %v337_v14 = vld [vmem:[%s2605_s6 + $0x358] sm:$0xff]  ;;  %v391_v19 = vpack.c.bf16 %v335_v12, %v328_v11  ;;  %v312_v12 = vld [vmem:[%s2605_s6 + $0x290] sm:$0xff] }
  0x41   : > { %975 = vmatprep.mubr.bf16.mxu1 %v366_v16  ;;  %2065 = vmatpush3.bf16.msra.mxu0 %v2342_v27  ;;  %v242_v16 = vld [vmem:[%s2605_s6 + $0x60] sm:$0xff]  ;;  %v393_v20 = vpack.c.bf16 %v337_v14, %v330_v13  ;;  %v305_v11 = vld [vmem:[%s2605_s6 + $0x258] sm:$0xff]  ;;  %v320_v13 = vld [vmem:[%s2605_s6 + $0x2d0] sm:$0xff] }
  0x42   : > { %2255 = vmatpush3.bf16.msra.mxu1 %v2342_v27  ;;  %2066 = vmatprep.subr.bf16.mxu0 %v2343_v32  ;;  %v347_v21 = vpack.c.bf16 %v242_v16, %v235_v15  ;;  %v249_v27 = vld [vmem:[%s2605_s6 + $0x98] sm:$0xff]  ;;  %v327_v14 = vld [vmem:[%s2605_s6 + $0x308] sm:$0xff]  ;;  %v382_v17 = vpack.c.bf16 %v312_v12, %v305_v11 }
  0x43   : > { %2248 = vmatprep.subr.bf16.mxu1 %v2343_v32  ;;  %v388_v32 = vpack.c.bf16 %v325_v26, %v318_v25  ;;  %v390_v18 = vpack.c.bf16 %v327_v14, %v320_v13  ;;  %v2350_v25 = vld [vmem:[%s2974_s2] sm:$0xff]   ;;  %v2351_v26 = vld [vmem:[%s2974_s2 + $0x8] sm:$0xff]  }
  0x45   : > { %2067 = vmatpush3.bf16.msra.mxu0 %v2344_v33 }
  0x46   : > { %2256 = vmatpush3.bf16.msra.mxu1 %v2344_v33  ;;  %2068 = vmatprep.subr.bf16.mxu0 %v2345_v42 }
  0x47   : > { %879 = vmatmul.mubr.bf16.gmra.mrb[12].mxu0 %v363_v28  ;;  %2249 = vmatprep.subr.bf16.mxu1 %v2345_v42  ;;  %v256_v28 = vld [vmem:[%s2605_s6 + $0xd0] sm:$0xff]  ;;  %v243_v42 = vld [vmem:[%s2605_s6 + $0x68] sm:$0xff] }
  0x48   : > { %976 = vmatmul.mubr.bf16.gmra.mrb[12].mxu1 %v365_v29  ;;  %886 = vmatprep.mubr.bf16.mxu0 %v371_v30  ;;  %v333_v29 = vld [vmem:[%s2605_s6 + $0x338] sm:$0xff]  ;;  %v340_v30 = vld [vmem:[%s2605_s6 + $0x370] sm:$0xff]  ;;  %v354_v33 = vpack.c.bf16 %v256_v28, %v249_v27 }
  0x49   : > { %983 = vmatprep.mubr.bf16.mxu1 %v373_v31  ;;  %2069 = vmatpush3.bf16.msra.mxu0 %v2346_v44  ;;  %v346_v31 = vpack.c.bf16 %v241_v24, %v234_v23  ;;  %v396_v34 = vpack.c.bf16 %v340_v30, %v333_v29  ;;  %v2352_v27 = vld [vmem:[%s2974_s2 + $0x10] sm:$0xff]   ;;  %v2353_v28 = vld [vmem:[%s2974_s2 + $0x18] sm:$0xff]   ;;  %v2354_v29 = vld [vmem:[%s2974_s2 + $0x20] sm:$0xff]  }
  0x4a   : > { %2257 = vmatpush3.bf16.msra.mxu1 %v2346_v44  ;;  %2070 = vmatprep.subr.bf16.mxu0 %v2347_v49  ;;  %v395_v44 = vpack.c.bf16 %v339_v38, %v332_v37  ;;  %v2355_v30 = vld [vmem:[%s2974_s2 + $0x28] sm:$0xff]  }
  0x4b   : > { %2250 = vmatprep.subr.bf16.mxu1 %v2347_v49  ;;  %v250_v49 = vld [vmem:[%s2605_s6 + $0xa0] sm:$0xff] }
  0x4c   : > { %v355_v56 = vpack.c.bf16 %v257_v50, %v250_v49 }
  0x4d   : > { %2071 = vmatpush3.bf16.msra.mxu0 %v2348_v52 }
  0x4e   : > { %2258 = vmatpush3.bf16.msra.mxu1 %v2348_v52  ;;  %v284_v52 = vld [vmem:[%s2605_s6 + $0x1b0] sm:$0xff] }
  0x4f   : > { %887 = vmatmul.mubr.bf16.gmra.mrb[16].mxu0 %v370_v43  ;;  %2161 = vmatprep.subr.bf16.mxu1 %v2349_v62  ;;  %v353_v43 = vpack.c.bf16 %v255_v36, %v248_v35  ;;  %v368_v57 = vpack.c.bf16 %v284_v52, %v277_v51  ;;  %v2817_v36 = vld [vmem:[%s2976_s4] ss:$0 sm:$0xff]  ;;  %v2361_v52 = vld [vmem:[%s2975_s3 + $0x18] sm:$0xff]  }
  0x50   : > { %984 = vmatmul.mubr.bf16.gmra.mrb[16].mxu1 %v372_v45  ;;  %894 = vmatprep.mubr.bf16.mxu0 %v378_v46  ;;  %v361_v45 = vpack.c.bf16 %v270_v40, %v263_v39  ;;  %v348_v46 = vpack.c.bf16 %v243_v42, %v236_v41 }
  0x51   : > { %991 = vmatprep.mubr.bf16.mxu1 %v380_v47  ;;  %v262_v47 = vld [vmem:[%s2605_s6 + $0x100] sm:$0xff] }
  0x52   : > { %v360_v55 = vpack.c.bf16 %v269_v48, %v262_v47 }
  0x57   : > { %895 = vmatmul.mubr.bf16.gmra.mrb[20].mxu0 %v377_v58  ;;  %v362_v58 = vpack.c.bf16 %v271_v54, %v264_v53 }
  0x58   : > { %992 = vmatmul.mubr.bf16.gmra.mrb[20].mxu1 %v379_v59  ;;  %902 = vmatprep.mubr.bf16.mxu0 %v385_v60  ;;  %v276_v59 = vld [vmem:[%s2605_s6 + $0x170] sm:$0xff]  ;;  %v283_v60 = vld [vmem:[%s2605_s6 + $0x1a8] sm:$0xff] }
  0x59   : > { %999 = vmatprep.mubr.bf16.mxu1 %v387_v61  ;;  %v278_v61 = vld [vmem:[%s2605_s6 + $0x180] sm:$0xff]  ;;  %v367_v3 = vpack.c.bf16 %v283_v60, %v276_v59 }
  0x5f   : > { %903 = vmatmul.mubr.bf16.gmra.mrb[24].mxu0 %v384_v7  ;;  %v290_v7 = vld [vmem:[%s2605_s6 + $0x1e0] sm:$0xff] }
  0x60   : > { %1000 = vmatmul.mubr.bf16.gmra.mrb[24].mxu1 %v386_v8  ;;  %910 = vmatprep.mubr.bf16.mxu0 %v392_v9  ;;  %v297_v8 = vld [vmem:[%s2605_s6 + $0x218] sm:$0xff]  ;;  %v306_v9 = vld [vmem:[%s2605_s6 + $0x260] sm:$0xff] }
  0x61   : > { %1007 = vmatprep.mubr.bf16.mxu1 %v394_v10  ;;  %v313_v10 = vld [vmem:[%s2605_s6 + $0x298] sm:$0xff]  ;;  %v374_v15 = vpack.c.bf16 %v297_v8, %v290_v7 }
  0x62   : > { %v383_v16 = vpack.c.bf16 %v313_v10, %v306_v9 }
  0x67   : > { %911 = vmatmul.mubr.bf16.gmra.mrb[28].mxu0 %v391_v19  ;;  %v304_v19 = vld [vmem:[%s2605_s6 + $0x250] sm:$0xff] }
  0x68   : > { %1008 = vmatmul.mubr.bf16.gmra.mrb[28].mxu1 %v393_v20  ;;  %1048 = vmatprep.mubr.bf16.mxu0 %v347_v21  ;;  %v311_v20 = vld [vmem:[%s2605_s6 + $0x288] sm:$0xff]  ;;  %v334_v21 = vld [vmem:[%s2605_s6 + $0x340] sm:$0xff] }
  0x69   : > { %1096 = vmatprep.mubr.bf16.mxu1 %v389_v22  ;;  %v341_v22 = vld [vmem:[%s2605_s6 + $0x378] sm:$0xff]  ;;  %v381_v23 = vpack.c.bf16 %v311_v20, %v304_v19 }
  0x6a   : > { %v397_v24 = vpack.c.bf16 %v341_v22, %v334_v21 }
  0x6f   : > { %1049 = vmatmul.mubr.bf16.vlgmr.msra.gmra.mrb[32].mxu0 %v346_v31  ;;  %v2356_v31 = vld [vmem:[%s2974_s2 + $0x30] sm:$0xff]  }
  0x70   : > { %1097 = vmatmul.mubr.bf16.vlgmr.msra.gmra.mrb[32].mxu1 %v388_v32  ;;  %1056 = vmatprep.mubr.bf16.mxu0 %v354_v33  ;;  %v2357_v32 = vld [vmem:[%s2974_s2 + $0x38] sm:$0xff]   ;;  %v2358_v33 = vld [vmem:[%s2975_s3] sm:$0xff]  }
  0x71   : > { %1104 = vmatprep.mubr.bf16.mxu1 %v396_v34  ;;  %2162 = vmatpush3.bf16.msra.mxu1 %v2349_v62  ;;  %v285_v62 = vld [vmem:[%s2605_s6 + $0x1b8] sm:$0xff]  ;;  %v2359_v34 = vld [vmem:[%s2975_s3 + $0x8] sm:$0xff]   ;;  %s218_s6 = sand.u32 1, %s2420_s19  }
  0x72   : > { %v369_v4 = vpack.c.bf16 %v285_v62, %v278_v61  ;;  %2179 = vmatprep.subr.bf16.mxu1 %v2350_v25  ;;  %2211 = vmatprep.subr.bf16.mxu0 %v2358_v33  ;;  %s1764_s30 = sshll.u32 %s218_s6, 6  ;;  %s2931_s22 = scalar_lea.sflag [#allocation3], %s218_s6 }
  0x73   : > { %2212 = vmatpush3.bf16.msra.mxu0 %v2358_v33  ;;  %s2910_s7 = scalar_lea.vmem [#allocation2], %s1764_s30 }
  0x74   : > { %2213 = vmatprep.subr.bf16.mxu0 %v2359_v34  ;;  %s1698_s9 = sshll.u32 %s2910_s7, 4  ;;  %s2925_s9 = int_to_ptr.vmem [resolvable:$true] %s1698_s9 }
  0x75   : > { %s2366_s13 = scalar_lea.vmem %s2925_s9, 1024  ;;  %p2373_p0 = scmp.lt.s32.totalorder %s2925_s9, %s2371_s15 }
  0x76   : > { %p2367_p11 = scmp.ne.s32.totalorder %s2925_s9, %s2366_s13  ;;  %p2374_p1 = scmp.lt.s32.totalorder %s2372_s16, %s2366_s13 }
  0x77   : > { %1057 = vmatmul.mubr.bf16.gmra.mrb[36].mxu0 %v353_v43 }
  0x78   : > { %1105 = vmatmul.mubr.bf16.gmra.mrb[36].mxu1 %v395_v44  ;;  %1064 = vmatprep.mubr.bf16.mxu0 %v361_v45  ;;  %v2360_v45 = vld [vmem:[%s2975_s3 + $0x10] sm:$0xff]   ;;  %p2368_p12 = pnand %p2367_p11, %p2501_p5  ;;  %p2375_p2 = por %p2374_p1, %p2373_p0 }
  0x79   : > { %2163 = vmatprep.mubr.msk.bf16.mxu1 %vm797_vm0, %v348_v46  ;;  %2214 = vmatpush3.bf16.msra.mxu0 %v2359_v34 }
  0x7a   : > { %2215 = vmatprep.subr.bf16.mxu0 %v2360_v45  ;;  %p2369_p13 = pneg %p2368_p12 }
  0x7c   : > { %p2376_p3 = pnand %p2375_p2, %p2369_p13 }
  0x7d   : > { %2216 = vmatpush3.bf16.msra.mxu0 %v2360_v45 }
  0x7e   : > { %2217 = vmatprep.subr.bf16.mxu0 %v2361_v52 }
  0x7f   : > { %1065 = vmatmul.mubr.bf16.gmra.mrb[40].mxu0 %v360_v55 }
  0x80   : > { %2164 = vmatmul.mubr.msk.bf16.vlgmr.msra.gmra.mrb[40].mxu1 %vm797_vm0, %v355_v56  ;;  %1072 = vmatprep.mubr.bf16.mxu0 %v368_v57 }
  0x81   : > { %2167 = vmatprep.mubr.msk.bf16.mxu1 %vm797_vm0, %v362_v58  ;;  %2180 = vmatpush3.bf16.msra.mxu1 %v2350_v25 }
  0x82   : > { %2181 = vmatprep.subr.bf16.mxu1 %v2351_v26  ;;  %2218 = vmatpush3.bf16.msra.mxu0 %v2361_v52 }
  0x83   : > { %2219 = vmatprep.subr.bf16.mxu0 %v2362_v63 }
  0x85   : > { %2182 = vmatpush3.bf16.msra.mxu1 %v2351_v26 }
  0x86   : > { %2183 = vmatprep.subr.bf16.mxu1 %v2352_v27  ;;  %2220 = vmatpush3.bf16.msra.mxu0 %v2362_v63 }
  0x87   : > { %1073 = vmatmul.mubr.bf16.gmra.mrb[44].mxu0 %v367_v3 }
  0x88   : > { %2168 = vmatmul.mubr.msk.bf16.gmra.mrb[44].mxu1 %vm797_vm0, %v369_v4  ;;  %1080 = vmatprep.mubr.bf16.mxu0 %v375_v5 }
  0x89   : > { %2171 = vmatprep.mubr.msk.bf16.mxu1 %vm797_vm0, %v376_v6  ;;  %2184 = vmatpush3.bf16.msra.mxu1 %v2352_v27  ;;  %v2363_v6 = vld [vmem:[%s2975_s3 + $0x28] sm:$0xff]  }
  0x8a   : > { %2185 = vmatprep.subr.bf16.mxu1 %v2353_v28  ;;  %2221 = vmatprep.subr.bf16.mxu0 %v2363_v6 }
  0x8b   : > { %2222 = vmatpush3.bf16.msra.mxu0 %v2363_v6 }
  0x8d   : > { %2186 = vmatpush3.bf16.msra.mxu1 %v2353_v28 }
  0x8e   : > { %2187 = vmatprep.subr.bf16.mxu1 %v2354_v29 }
  0x8f   : > { %1081 = vmatmul.mubr.bf16.gmra.mrb[48].mxu0 %v374_v15 }
  0x90   : > { %2172 = vmatmul.mubr.msk.bf16.gmra.mrb[48].mxu1 %vm797_vm0, %v383_v16  ;;  %1088 = vmatprep.mubr.bf16.mxu0 %v382_v17 }
  0x91   : > { %2175 = vmatprep.mubr.msk.bf16.mxu1 %vm797_vm0, %v390_v18  ;;  %2188 = vmatpush3.bf16.msra.mxu1 %v2354_v29 }
  0x92   : > { %2189 = vmatprep.subr.bf16.mxu1 %v2355_v30 }
  0x95   : > { %2190 = vmatpush3.bf16.msra.mxu1 %v2355_v30 }
  0x96   : > { %2191 = vmatprep.subr.bf16.mxu1 %v2356_v31 }
  0x97   : > { %1089 = vmatmul.mubr.bf16.gmra.mrb[52].mxu0 %v381_v23 }
  0x98   : > { %2176 = vmatmul.mubr.msk.bf16.gmra.mrb[52].mxu1 %vm797_vm0, %v397_v24 }
  0x99   : > { %2192 = vmatpush3.bf16.msra.mxu1 %v2356_v31 }
  0x9a   : > { %2193 = vmatprep.subr.bf16.mxu1 %v2357_v32 }
  0x9d   : > { %2194 = vmatpush3.bf16.msra.mxu1 %v2357_v32 }
 0x102   : > { %v1944_v35 = vpop.f32.mrb[0].mxu0 }
 0x103   : > { %v1945_v37 = vpop.f32.mrb[1].mxu0  ;;  %v2008_v38 = vpop.f32.mrb[0].mxu1 }
 0x104   : > { %v1946_v39 = vadd.f32 %v1945_v37, %v1944_v35  ;;  %v1947_v40 = vpop.f32.mrb[2].mxu0  ;;  %v2009_v41 = vpop.f32.mrb[1].mxu1 }
 0x105   : > { %v1948_v42 = vpop.f32.mrb[3].mxu0  ;;  %v2010_v43 = vadd.f32 %v2009_v41, %v2008_v38  ;;  %v2011_v44 = vpop.f32.mrb[2].mxu1 }
 0x106   : > { %v857_v46 = vadd.f32 %v1946_v39, %v2817_v36  ;;  %v1949_v47 = vadd.f32 %v1948_v42, %v1947_v40  ;;  %v2012_v48 = vpop.f32.mrb[3].mxu1 }
 0x107   : > { %v2013_v49 = vadd.f32 %v2012_v48, %v2011_v44 }
 0x108   : > { %v860_v50 = vadd.f32 %v1949_v47, %v2817_v36  ;;  %v2824_v51 = vadd.f32 %v2010_v43, %v857_v46 }
 0x10a   : > { %v2829_v53 = vadd.f32 %v2013_v49, %v860_v50  ;;  %v1950_v54 = vpop.f32.mrb[4].mxu0 }
 0x10b   : > { %v1951_v55 = vpop.f32.mrb[5].mxu0  ;;  %v2014_v56 = vpop.f32.mrb[4].mxu1 }
 0x10c   : > { %v1952_v57 = vadd.f32 %v1951_v55, %v1950_v54  ;;  %v1953_v58 = vpop.f32.mrb[6].mxu0  ;;  %v2015_v59 = vpop.f32.mrb[5].mxu1 }
 0x10d   : > { %v1954_v60 = vpop.f32.mrb[7].mxu0  ;;  %v2016_v61 = vadd.f32 %v2015_v59, %v2014_v56  ;;  %v2017_v62 = vpop.f32.mrb[6].mxu1 }
 0x10e   : > { %v865_v0 = vadd.f32 %v1952_v57, %v2817_v36  ;;  %v1955_v1 = vadd.f32 %v1954_v60, %v1953_v58  ;;  %v2018_v2 = vpop.f32.mrb[7].mxu1 }
 0x10f   : > { %v2019_v3 = vadd.f32 %v2018_v2, %v2017_v62 }
 0x110   : > { %v868_v4 = vadd.f32 %v1955_v1, %v2817_v36  ;;  %v2836_v5 = vadd.f32 %v2016_v61, %v865_v0 }
 0x112   : > { %v2841_v7 = vadd.f32 %v2019_v3, %v868_v4  ;;  %v1956_v8 = vpop.f32.mrb[8].mxu0 }
 0x113   : > { %v1957_v9 = vpop.f32.mrb[9].mxu0  ;;  %v2020_v10 = vpop.f32.mrb[8].mxu1 }
 0x114   : > { %v1958_v11 = vadd.f32 %v1957_v9, %v1956_v8  ;;  %v1959_v12 = vpop.f32.mrb[10].mxu0  ;;  %v2021_v13 = vpop.f32.mrb[9].mxu1 }
 0x115   : > { %v1960_v14 = vpop.f32.mrb[11].mxu0  ;;  %v2022_v15 = vadd.f32 %v2021_v13, %v2020_v10  ;;  %v2023_v16 = vpop.f32.mrb[10].mxu1 }
 0x116   : > { %v873_v17 = vadd.f32 %v1958_v11, %v2817_v36  ;;  %v1961_v18 = vadd.f32 %v1960_v14, %v1959_v12  ;;  %v2024_v19 = vpop.f32.mrb[11].mxu1 }
 0x117   : > { %v2025_v20 = vadd.f32 %v2024_v19, %v2023_v16 }
 0x118   : > { %v876_v21 = vadd.f32 %v1961_v18, %v2817_v36  ;;  %v2845_v22 = vadd.f32 %v2022_v15, %v873_v17 }
 0x11a   : > { %v2847_v23 = vadd.f32 %v2025_v20, %v876_v21  ;;  %v1962_v24 = vpop.f32.mrb[12].mxu0 }
 0x11b   : > { %v1963_v25 = vpop.f32.mrb[13].mxu0  ;;  %v2026_v26 = vpop.f32.mrb[12].mxu1 }
 0x11c   : > { %v1964_v27 = vadd.f32 %v1963_v25, %v1962_v24  ;;  %v1965_v28 = vpop.f32.mrb[14].mxu0  ;;  %v2027_v29 = vpop.f32.mrb[13].mxu1 }
 0x11d   : > { %v1966_v30 = vpop.f32.mrb[15].mxu0  ;;  %v2028_v31 = vadd.f32 %v2027_v29, %v2026_v26  ;;  %v2029_v32 = vpop.f32.mrb[14].mxu1 }
 0x11e   : > { %v881_v33 = vadd.f32 %v1964_v27, %v2817_v36  ;;  %v1967_v34 = vadd.f32 %v1966_v30, %v1965_v28  ;;  %v2030_v35 = vpop.f32.mrb[15].mxu1 }
 0x11f   : > { %v2031_v37 = vadd.f32 %v2030_v35, %v2029_v32 }
 0x120   : > { %v884_v38 = vadd.f32 %v1967_v34, %v2817_v36  ;;  %v2851_v39 = vadd.f32 %v2028_v31, %v881_v33 }
 0x122   : > { %v2853_v40 = vadd.f32 %v2031_v37, %v884_v38  ;;  %v1968_v41 = vpop.f32.mrb[16].mxu0 }
 0x123   : > { %v1969_v42 = vpop.f32.mrb[17].mxu0  ;;  %v2032_v43 = vpop.f32.mrb[16].mxu1 }
 0x124   : > { %v1970_v44 = vadd.f32 %v1969_v42, %v1968_v41  ;;  %v1971_v45 = vpop.f32.mrb[18].mxu0  ;;  %v2033_v46 = vpop.f32.mrb[17].mxu1 }
 0x125   : > { %v1972_v47 = vpop.f32.mrb[19].mxu0  ;;  %v2034_v48 = vadd.f32 %v2033_v46, %v2032_v43  ;;  %v2035_v49 = vpop.f32.mrb[18].mxu1 }
 0x126   : > { %v889_v50 = vadd.f32 %v1970_v44, %v2817_v36  ;;  %v1973_v52 = vadd.f32 %v1972_v47, %v1971_v45  ;;  %v2036_v54 = vpop.f32.mrb[19].mxu1 }
 0x127   : > { %v2037_v55 = vadd.f32 %v2036_v54, %v2035_v49 }
 0x128   : > { %v892_v56 = vadd.f32 %v1973_v52, %v2817_v36  ;;  %v2857_v57 = vadd.f32 %v2034_v48, %v889_v50 }
 0x12a   : > { %v2859_v58 = vadd.f32 %v2037_v55, %v892_v56  ;;  %v1974_v59 = vpop.f32.mrb[20].mxu0 }
 0x12b   : > { %v1975_v60 = vpop.f32.mrb[21].mxu0  ;;  %v2038_v61 = vpop.f32.mrb[20].mxu1 }
 0x12c   : > { %v1976_v62 = vadd.f32 %v1975_v60, %v1974_v59  ;;  %v1977_v63 = vpop.f32.mrb[22].mxu0  ;;  %v2039_v0 = vpop.f32.mrb[21].mxu1 }
 0x12d   : > { %v1978_v1 = vpop.f32.mrb[23].mxu0  ;;  %v2040_v2 = vadd.f32 %v2039_v0, %v2038_v61  ;;  %v2041_v3 = vpop.f32.mrb[22].mxu1 }
 0x12e   : > { %v897_v4 = vadd.f32 %v1976_v62, %v2817_v36  ;;  %v1979_v6 = vadd.f32 %v1978_v1, %v1977_v63  ;;  %v2042_v8 = vpop.f32.mrb[23].mxu1 }
 0x12f   : > { %v2043_v9 = vadd.f32 %v2042_v8, %v2041_v3 }
 0x130   : > { %v900_v10 = vadd.f32 %v1979_v6, %v2817_v36  ;;  %v2863_v11 = vadd.f32 %v2040_v2, %v897_v4 }
 0x132   : > { %v2865_v12 = vadd.f32 %v2043_v9, %v900_v10  ;;  %v1980_v13 = vpop.f32.mrb[24].mxu0 }
 0x133   : > { %v1981_v14 = vpop.f32.mrb[25].mxu0  ;;  %v2044_v15 = vpop.f32.mrb[24].mxu1 }
 0x134   : > { %v1982_v16 = vadd.f32 %v1981_v14, %v1980_v13  ;;  %v1983_v17 = vpop.f32.mrb[26].mxu0  ;;  %v2045_v18 = vpop.f32.mrb[25].mxu1 }
 0x135   : > { %v1984_v19 = vpop.f32.mrb[27].mxu0  ;;  %v2046_v20 = vadd.f32 %v2045_v18, %v2044_v15  ;;  %v2047_v21 = vpop.f32.mrb[26].mxu1 }
 0x136   : > { %v905_v24 = vadd.f32 %v1982_v16, %v2817_v36  ;;  %v1985_v25 = vadd.f32 %v1984_v19, %v1983_v17  ;;  %v2048_v26 = vpop.f32.mrb[27].mxu1 }
 0x137   : > { %v2049_v27 = vadd.f32 %v2048_v26, %v2047_v21 }
 0x138   : > { %v908_v28 = vadd.f32 %v1985_v25, %v2817_v36  ;;  %v1002_v29 = vadd.f32 %v2046_v20, %v905_v24 }
 0x13a   : > { %v1005_v30 = vadd.f32 %v2049_v27, %v908_v28  ;;  %v1986_v31 = vpop.f32.mrb[28].mxu0 }
 0x13b   : > { %v1987_v32 = vpop.f32.mrb[29].mxu0  ;;  %v2050_v33 = vpop.f32.mrb[28].mxu1 }
 0x13c   : > { %v1988_v34 = vadd.f32 %v1987_v32, %v1986_v31  ;;  %v1989_v35 = vpop.f32.mrb[30].mxu0  ;;  %v2051_v37 = vpop.f32.mrb[29].mxu1 }
 0x13d   : > { %v1990_v38 = vpop.f32.mrb[31].mxu0  ;;  %v2052_v41 = vadd.f32 %v2051_v37, %v2050_v33  ;;  %v2053_v42 = vpop.f32.mrb[30].mxu1 }
 0x13e   : > { %v913_v43 = vadd.f32 %v1988_v34, %v2817_v36  ;;  %v1991_v44 = vadd.f32 %v1990_v38, %v1989_v35  ;;  %v2054_v45 = vpop.f32.mrb[31].mxu1 }
 0x13f   : > { %v2055_v46 = vadd.f32 %v2054_v45, %v2053_v42 }
 0x140   : > { %v916_v47 = vadd.f32 %v1991_v44, %v2817_v36  ;;  %v1010_v48 = vadd.f32 %v2052_v41, %v913_v43 }
 0x142   : > { %v1013_v49 = vadd.f32 %v2055_v46, %v916_v47  ;;  %v2072_v50 = vpop.f32.mrb[32].mxu0 }
 0x143   : > { %v2108_v52 = vpop.f32.mrb[32].mxu1  ;;  %v2073_v54 = vpop.f32.mrb[33].mxu0 }
 0x144   : > { %v2074_v55 = vadd.f32 %v2073_v54, %v2072_v50  ;;  %v2109_v56 = vpop.f32.mrb[33].mxu1  ;;  %v2075_v59 = vpop.f32.mrb[34].mxu0 }
 0x145   : > { %v2110_v60 = vadd.f32 %v2109_v56, %v2108_v52  ;;  %v2111_v61 = vpop.f32.mrb[34].mxu1  ;;  %v2076_v62 = vpop.f32.mrb[35].mxu0 }
 0x146   : > { %v2077_v63 = vadd.f32 %v2076_v62, %v2075_v59  ;;  %v2112_v0 = vpop.f32.mrb[35].mxu1  ;;  %v1051_v1 = vadd.f32 %v2074_v55, %v2824_v51 }
 0x147   : > { %v2113_v2 = vadd.f32 %v2112_v0, %v2111_v61  ;;  %v2872_v3 = vadd.f32 %v2110_v60, %v1002_v29 }
 0x148   : > { %v1054_v36 = vadd.f32 %v2077_v63, %v2829_v53 }
 0x149   : > { %v2875_v4 = vadd.f32 %v2113_v2, %v1005_v30 }
 0x14a   : > { %v2078_v6 = vpop.f32.mrb[36].mxu0 }
 0x14b   : > { %v2114_v8 = vpop.f32.mrb[36].mxu1  ;;  %v2079_v9 = vpop.f32.mrb[37].mxu0 }
 0x14c   : > { %v2080_v10 = vadd.f32 %v2079_v9, %v2078_v6  ;;  %v2115_v13 = vpop.f32.mrb[37].mxu1  ;;  %v2081_v14 = vpop.f32.mrb[38].mxu0 }
 0x14d   : > { %v2116_v15 = vadd.f32 %v2115_v13, %v2114_v8  ;;  %v2117_v16 = vpop.f32.mrb[38].mxu1  ;;  %v2082_v17 = vpop.f32.mrb[39].mxu0 }
 0x14e   : > { %v2083_v18 = vadd.f32 %v2082_v17, %v2081_v14  ;;  %v2118_v19 = vpop.f32.mrb[39].mxu1  ;;  %v1059_v51 = vadd.f32 %v2080_v10, %v2836_v5 }
 0x14f   : > { %v2119_v20 = vadd.f32 %v2118_v19, %v2117_v16  ;;  %v2878_v21 = vadd.f32 %v2116_v15, %v1010_v48 }
 0x150   : > { %v1062_v53 = vadd.f32 %v2083_v18, %v2841_v7 }
 0x151   : > { %v2881_v24 = vadd.f32 %v2119_v20, %v1013_v49 }
 0x152   : > { %v2084_v25 = vpop.f32.mrb[40].mxu0 }
 0x153   : > { %v2165_v26 = vpop.f32.mrb[40].mxu1  ;;  %v2085_v27 = vpop.f32.mrb[41].mxu0 }
 0x154   : > { %v1156_v28 = vadd.f32 %v2165_v26, %v1059_v51  ;;  %v2086_v29 = vadd.f32 %v2085_v27, %v2084_v25  ;;  %v1147_v30 = vpop.f32.mrb[41].mxu1  ;;  %v2087_v31 = vpop.f32.mrb[42].mxu0 }
 0x155   : > { %v1148_v32 = vadd.f32 %v1147_v30, %v1051_v1  ;;  %v2166_v33 = vpop.f32.mrb[42].mxu1  ;;  %v2088_v34 = vpop.f32.mrb[43].mxu0 }
 0x156   : > { %v1159_v35 = vadd.f32 %v2166_v33, %v1062_v53  ;;  %v2089_v37 = vadd.f32 %v2088_v34, %v2087_v31  ;;  %v1150_v5 = vpop.f32.mrb[43].mxu1  ;;  %v1067_v38 = vadd.f32 %v2086_v29, %v2845_v22  ;;  %v1212_v42 = vmax.f32 %v1156_v28, 0.0 }
 0x157   : > { %v1151_v41 = vadd.f32 %v1150_v5, %v1054_v36  ;;  %v1210_v44 = vmax.f32 %v1148_v32, 0.0 }
 0x158   : > { %v1213_v7 = vmax.f32 %v1159_v35, 0.0  ;;  %v1070_v43 = vadd.f32 %v2089_v37, %v2847_v23 }
 0x159   : > { %v1211_v45 = vmax.f32 %v1151_v41, 0.0 }
 0x15a   : > { %v1227_v46 = vpack.c.bf16 %v1213_v7, %v1212_v42  ;;  %v2090_v47 = vpop.f32.mrb[44].mxu0 }
 0x15b   : > { %v1226_v48 = vpack.c.bf16 %v1211_v45, %v1210_v44  ;;  %v2169_v49 = vpop.f32.mrb[44].mxu1  ;;  %v2091_v50 = vpop.f32.mrb[45].mxu0 }
 0x15c   : > { %v2092_v52 = vadd.f32 %v2091_v50, %v2090_v47  ;;  %v1163_v54 = vpop.f32.mrb[45].mxu1  ;;  %v2093_v55 = vpop.f32.mrb[46].mxu0 }
 0x15d   : > { %v1164_v56 = vadd.f32 %v1163_v54, %v1067_v38  ;;  %v2170_v59 = vpop.f32.mrb[46].mxu1  ;;  %2195 = vmatprep.mubr.bf16.mxu1 %v1226_v48  ;;  %v2094_v60 = vpop.f32.mrb[47].mxu0 }
 0x15e   : > { %v1075_v22 = vadd.f32 %v2092_v52, %v2851_v39  ;;  %v2095_v61 = vadd.f32 %v2094_v60, %v2093_v55  ;;  %v1166_v62 = vpop.f32.mrb[47].mxu1  ;;  %2196 = vmatmul.mubr.bf16.vlgmr.msra.gmra.mrb[56].mxu1 %v1227_v46 }
 0x15f   : > { %v1167_v23 = vadd.f32 %v1166_v62, %v1070_v43  ;;  %v1214_v1 = vmax.f32 %v1164_v56, 0.0 }
 0x160   : > { %v1172_v63 = vadd.f32 %v2169_v49, %v1075_v22  ;;  %v1078_v0 = vadd.f32 %v2095_v61, %v2853_v40 }
 0x161   : > { %v1215_v2 = vmax.f32 %v1167_v23, 0.0 }
 0x162   : > { %v1175_v36 = vadd.f32 %v2170_v59, %v1078_v0  ;;  %v2096_v6 = vpop.f32.mrb[48].mxu0  ;;  %v1216_v13 = vmax.f32 %v1172_v63, 0.0 }
 0x163   : > { %v1228_v8 = vpack.c.bf16 %v1215_v2, %v1214_v1  ;;  %v2097_v9 = vpop.f32.mrb[49].mxu0  ;;  %v2173_v10 = vpop.f32.mrb[48].mxu1 }
 0x164   : > { %v1217_v14 = vmax.f32 %v1175_v36, 0.0  ;;  %v2098_v15 = vadd.f32 %v2097_v9, %v2096_v6  ;;  %v2099_v16 = vpop.f32.mrb[50].mxu0  ;;  %v1179_v17 = vpop.f32.mrb[49].mxu1 }
 0x165   : > { %2199 = vmatprep.mubr.bf16.mxu1 %v1228_v8  ;;  %v2100_v39 = vpop.f32.mrb[51].mxu0  ;;  %v2174_v18 = vpop.f32.mrb[50].mxu1 }
 0x166   : > { %v2101_v19 = vadd.f32 %v2100_v39, %v2099_v16  ;;  %v1083_v51 = vadd.f32 %v2098_v15, %v2857_v57  ;;  %v1229_v20 = vpack.c.bf16 %v1217_v14, %v1216_v13  ;;  %v1182_v40 = vpop.f32.mrb[51].mxu1 }
 0x168   : > { %v1180_v53 = vadd.f32 %v1179_v17, %v1083_v51  ;;  %2200 = vmatmul.mubr.bf16.gmra.mrb[60].mxu1 %v1229_v20  ;;  %v1086_v25 = vadd.f32 %v2101_v19, %v2859_v58 }
 0x16a   : > { %v1183_v26 = vadd.f32 %v1182_v40, %v1086_v25  ;;  %v2102_v27 = vpop.f32.mrb[52].mxu0  ;;  %v1218_v30 = vmax.f32 %v1180_v53, 0.0 }
 0x16b   : > { %v2177_v28 = vpop.f32.mrb[52].mxu1  ;;  %v2103_v29 = vpop.f32.mrb[53].mxu0 }
 0x16c   : > { %v1219_v31 = vmax.f32 %v1183_v26, 0.0  ;;  %v1204_v32 = vadd.f32 %v2177_v28, %v2878_v21  ;;  %v2104_v33 = vadd.f32 %v2103_v29, %v2102_v27  ;;  %v1195_v34 = vpop.f32.mrb[53].mxu1  ;;  %v2105_v35 = vpop.f32.mrb[54].mxu0 }
 0x16d   : > { %v1196_v37 = vadd.f32 %v1195_v34, %v2872_v3  ;;  %v2178_v57 = vpop.f32.mrb[54].mxu1  ;;  %v2106_v5 = vpop.f32.mrb[55].mxu0 }
 0x16e   : > { %v1230_v38 = vpack.c.bf16 %v1219_v31, %v1218_v30  ;;  %v1091_v41 = vadd.f32 %v2104_v33, %v2863_v11  ;;  %v1207_v58 = vadd.f32 %v2178_v57, %v2881_v24  ;;  %v1198_v42 = vpop.f32.mrb[55].mxu1  ;;  %v2107_v7 = vadd.f32 %v2106_v5, %v2105_v35  ;;  %v1825_v24 = vld [vmem:[%s2976_s4 + $0x1] ss:$0 sm:$0xff] }
 0x16f   : > { %v1199_v43 = vadd.f32 %v1198_v42, %v2875_v4  ;;  %v1224_v44 = vmax.f32 %v1204_v32, 0.0  ;;  %v1222_v21 = vmax.f32 %v1196_v37, 0.0  ;;  %v2364_v4 = vld [vmem:[%s2975_s3 + $0x30] sm:$0xff]  }
 0x170   : > { %v1188_v45 = vadd.f32 %v2173_v10, %v1091_v41  ;;  %v1225_v46 = vmax.f32 %v1207_v58, 0.0  ;;  %2203 = vmatprep.mubr.bf16.mxu1 %v1230_v38  ;;  %v1094_v47 = vadd.f32 %v2107_v7, %v2865_v12  ;;  %2223 = vmatprep.subr.bf16.mxu0 %v2364_v4  ;;  %v2365_v12 = vld [vmem:[%s2975_s3 + $0x38] sm:$0xff]  }
 0x171   : > { %v1223_v48 = vmax.f32 %v1199_v43, 0.0  ;;  %2224 = vmatpush3.bf16.msra.mxu0 %v2364_v4 }
 0x172   : > { %v1233_v3 = vpack.c.bf16 %v1225_v46, %v1224_v44  ;;  %v1191_v49 = vadd.f32 %v2174_v18, %v1094_v47  ;;  %v1220_v52 = vmax.f32 %v1188_v45, 0.0  ;;  %2225 = vmatprep.subr.bf16.mxu0 %v2365_v12 }
 0x173   : > { %v1232_v50 = vpack.c.bf16 %v1223_v48, %v1222_v21 }
 0x174   : > { %v1221_v54 = vmax.f32 %v1191_v49, 0.0  ;;  %v1834_v49 = vld [vmem:[%s2976_s4 + $0x2] ss:$0 sm:$0xff] }
 0x175   : > { %2226 = vmatpush3.bf16.msra.mxu0 %v2365_v12 }
 0x176   : > { %v1231_v11 = vpack.c.bf16 %v1221_v54, %v1220_v52 }
 0x178   : > { %2204 = vmatmul.mubr.bf16.gmra.mrb[64].mxu1 %v1231_v11 }
 0x179   : > { %2207 = vmatprep.mubr.bf16.mxu1 %v1232_v50 }
 0x180   : > { %2208 = vmatmul.mubr.bf16.gmra.mrb[68].mxu1 %v1233_v3 }
 0x231   : > { %v2197_v55 = vpop.f32.mrb[56].mxu1 }
 0x232   : > { %v1345_v56 = vadd.f32 %v2197_v55, %v1825_v24  ;;  %v1336_v59 = vpop.f32.mrb[57].mxu1 }
 0x233   : > { %v1337_v60 = vadd.f32 %v1825_v24, %v1336_v59  ;;  %v2198_v22 = vpop.f32.mrb[58].mxu1 }
 0x234   : > { %v1348_v61 = vadd.f32 %v2198_v22, %v1825_v24  ;;  %v1339_v62 = vpop.f32.mrb[59].mxu1  ;;  %v1401_v63 = vmax.f32 %v1345_v56, 0.0 }
 0x235   : > { %v1340_v23 = vadd.f32 %v1825_v24, %v1339_v62  ;;  %v1399_v1 = vmax.f32 %v1337_v60, 0.0 }
 0x236   : > { %v1402_v0 = vmax.f32 %v1348_v61, 0.0 }
 0x237   : > { %v1400_v2 = vmax.f32 %v1340_v23, 0.0 }
 0x238   : > { %v1416_v36 = vpack.c.bf16 %v1402_v0, %v1401_v63 }
 0x239   : > { %v1415_v6 = vpack.c.bf16 %v1400_v2, %v1399_v1 }
 0x23b   : > { %2227 = vmatprep.mubr.bf16.mxu0 %v1415_v6  ;;  %v2201_v8 = vpop.f32.mrb[60].mxu1 }
 0x23c   : > { %v1361_v9 = vadd.f32 %v2201_v8, %v1825_v24  ;;  %2228 = vmatmul.mubr.bf16.vlgmr.msra.gmra.mrb[56].mxu0 %v1416_v36  ;;  %v1352_v10 = vpop.f32.mrb[61].mxu1 }
 0x23d   : > { %v1353_v13 = vadd.f32 %v1825_v24, %v1352_v10  ;;  %v2202_v14 = vpop.f32.mrb[62].mxu1 }
 0x23e   : > { %v1364_v15 = vadd.f32 %v2202_v14, %v1825_v24  ;;  %v1355_v16 = vpop.f32.mrb[63].mxu1  ;;  %v1405_v39 = vmax.f32 %v1361_v9, 0.0 }
 0x23f   : > { %v1356_v17 = vadd.f32 %v1825_v24, %v1355_v16  ;;  %v1403_v19 = vmax.f32 %v1353_v13, 0.0 }
 0x240   : > { %v1406_v18 = vmax.f32 %v1364_v15, 0.0 }
 0x241   : > { %v1404_v51 = vmax.f32 %v1356_v17, 0.0 }
 0x242   : > { %v1418_v20 = vpack.c.bf16 %v1406_v18, %v1405_v39 }
 0x243   : > { %v1417_v40 = vpack.c.bf16 %v1404_v51, %v1403_v19 }
 0x245   : > { %2231 = vmatprep.mubr.bf16.mxu0 %v1417_v40 }
 0x246   : > { %2232 = vmatmul.mubr.bf16.gmra.mrb[60].mxu0 %v1418_v20 }
 0x24b   : > { %v2205_v53 = vpop.f32.mrb[64].mxu1 }
 0x24c   : > { %v1377_v25 = vadd.f32 %v2205_v53, %v1825_v24  ;;  %v1368_v26 = vpop.f32.mrb[65].mxu1 }
 0x24d   : > { %v1369_v27 = vadd.f32 %v1825_v24, %v1368_v26  ;;  %v2206_v28 = vpop.f32.mrb[66].mxu1 }
 0x24e   : > { %v1380_v29 = vadd.f32 %v2206_v28, %v1825_v24  ;;  %v1371_v30 = vpop.f32.mrb[67].mxu1  ;;  %v1409_v32 = vmax.f32 %v1377_v25, 0.0 }
 0x24f   : > { %v1372_v31 = vadd.f32 %v1825_v24, %v1371_v30  ;;  %v1407_v34 = vmax.f32 %v1369_v27, 0.0 }
 0x250   : > { %v1410_v33 = vmax.f32 %v1380_v29, 0.0 }
 0x251   : > { %v1408_v35 = vmax.f32 %v1372_v31, 0.0 }
 0x252   : > { %v1420_v37 = vpack.c.bf16 %v1410_v33, %v1409_v32 }
 0x253   : > { %v1419_v57 = vpack.c.bf16 %v1408_v35, %v1407_v34  ;;  %v2209_v5 = vpop.f32.mrb[68].mxu1 }
 0x254   : > { %v1393_v38 = vadd.f32 %v2209_v5, %v1825_v24  ;;  %v1384_v41 = vpop.f32.mrb[69].mxu1 }
 0x255   : > { %v1385_v58 = vadd.f32 %v1825_v24, %v1384_v41  ;;  %v2210_v42 = vpop.f32.mrb[70].mxu1  ;;  %2235 = vmatprep.mubr.bf16.mxu0 %v1419_v57 }
 0x256   : > { %v1396_v7 = vadd.f32 %v2210_v42, %v1825_v24  ;;  %v1387_v43 = vpop.f32.mrb[71].mxu1  ;;  %2236 = vmatmul.mubr.bf16.gmra.mrb[64].mxu0 %v1420_v37  ;;  %v1413_v45 = vmax.f32 %v1393_v38, 0.0 }
 0x257   : > { %v1388_v44 = vadd.f32 %v1825_v24, %v1387_v43  ;;  %v1411_v21 = vmax.f32 %v1385_v58, 0.0 }
 0x258   : > { %v1414_v46 = vmax.f32 %v1396_v7, 0.0 }
 0x259   : > { %v1412_v47 = vmax.f32 %v1388_v44, 0.0 }
 0x25a   : > { %v1422_v48 = vpack.c.bf16 %v1414_v46, %v1413_v45 }
 0x25b   : > { %v1421_v3 = vpack.c.bf16 %v1412_v47, %v1411_v21 }
 0x25d   : > { %2239 = vmatprep.mubr.bf16.mxu0 %v1421_v3 }
 0x25e   : > { %2240 = vmatmul.mubr.bf16.gmra.mrb[68].mxu0 %v1422_v48 }
 0x30f   : > { %v2229_v50 = vpop.f32.mrb[56].mxu0 }
 0x310   : > { %v1534_v52 = vadd.f32 %v2229_v50, %v1834_v49  ;;  %v1525_v54 = vpop.f32.mrb[57].mxu0 }
 0x311   : > { %v1526_v11 = vadd.f32 %v1834_v49, %v1525_v54  ;;  %v2230_v4 = vpop.f32.mrb[58].mxu0 }
 0x312   : > { %v1537_v12 = vadd.f32 %v2230_v4, %v1834_v49  ;;  %v1528_v24 = vpop.f32.mrb[59].mxu0  ;;  %v1590_v56 = vmax.f32 %v1534_v52, 0.0 }
 0x313   : > { %v1529_v55 = vadd.f32 %v1834_v49, %v1528_v24  ;;  %v1588_v60 = vmax.f32 %v1526_v11, 0.0 }
 0x314   : > { %v1591_v59 = vmax.f32 %v1537_v12, 0.0 }
 0x315   : > { %v1589_v22 = vmax.f32 %v1529_v55, 0.0 }
 0x316   : > { %v1889_v61 = vpack.c.bf16 %v1591_v59, %v1590_v56 }
 0x317   : > { %v1884_v62 = vpack.c.bf16 %v1589_v22, %v1588_v60 }
 0x318   : > { %1921 = vst [vmem:[%s2910_s7 + $0x8] sm:$0xff] %v1889_v61  }
 0x319   : > { %1885 = vst [vmem:[%s2910_s7] sm:$0xff] %v1884_v62   ;;  %v2233_v23 = vpop.f32.mrb[60].mxu0 }
 0x31a   : > { %v1550_v63 = vadd.f32 %v2233_v23, %v1834_v49  ;;  %v1541_v0 = vpop.f32.mrb[61].mxu0 }
 0x31b   : > { %v1542_v1 = vadd.f32 %v1834_v49, %v1541_v0  ;;  %v2234_v2 = vpop.f32.mrb[62].mxu0 }
 0x31c   : > { %v1553_v36 = vadd.f32 %v2234_v2, %v1834_v49  ;;  %v1544_v6 = vpop.f32.mrb[63].mxu0  ;;  %v1594_v9 = vmax.f32 %v1550_v63, 0.0 }
 0x31d   : > { %v1545_v8 = vadd.f32 %v1834_v49, %v1544_v6  ;;  %v1592_v13 = vmax.f32 %v1542_v1, 0.0 }
 0x31e   : > { %v1595_v10 = vmax.f32 %v1553_v36, 0.0 }
 0x31f   : > { %v1593_v14 = vmax.f32 %v1545_v8, 0.0 }
 0x320   : > { %v1899_v15 = vpack.c.bf16 %v1595_v10, %v1594_v9 }
 0x321   : > { %v1894_v16 = vpack.c.bf16 %v1593_v14, %v1592_v13 }
 0x322   : > { %1923 = vst [vmem:[%s2910_s7 + $0x18] sm:$0xff] %v1899_v15  }
 0x323   : > { %1922 = vst [vmem:[%s2910_s7 + $0x10] sm:$0xff] %v1894_v16  }
 0x329   : > { %v2237_v17 = vpop.f32.mrb[64].mxu0 }
 0x32a   : > { %v1566_v39 = vadd.f32 %v2237_v17, %v1834_v49  ;;  %v1557_v18 = vpop.f32.mrb[65].mxu0 }
 0x32b   : > { %v1558_v19 = vadd.f32 %v1834_v49, %v1557_v18  ;;  %v2238_v51 = vpop.f32.mrb[66].mxu0 }
 0x32c   : > { %v1569_v20 = vadd.f32 %v2238_v51, %v1834_v49  ;;  %v1560_v40 = vpop.f32.mrb[67].mxu0  ;;  %v1598_v25 = vmax.f32 %v1566_v39, 0.0 }
 0x32d   : > { %v1561_v53 = vadd.f32 %v1834_v49, %v1560_v40  ;;  %v1596_v27 = vmax.f32 %v1558_v19, 0.0 }
 0x32e   : > { %v1599_v26 = vmax.f32 %v1569_v20, 0.0 }
 0x32f   : > { %v1597_v28 = vmax.f32 %v1561_v53, 0.0 }
 0x330   : > { %v1909_v29 = vpack.c.bf16 %v1599_v26, %v1598_v25 }
 0x331   : > { %v1904_v30 = vpack.c.bf16 %v1597_v28, %v1596_v27  ;;  %v2241_v31 = vpop.f32.mrb[68].mxu0 }
 0x332   : > { %1925 = vst [vmem:[%s2910_s7 + $0x28] sm:$0xff] %v1909_v29   ;;  %v1582_v32 = vadd.f32 %v2241_v31, %v1834_v49  ;;  %v1573_v33 = vpop.f32.mrb[69].mxu0 }
 0x333   : > { %1924 = vst [vmem:[%s2910_s7 + $0x20] sm:$0xff] %v1904_v30   ;;  %v1574_v34 = vadd.f32 %v1834_v49, %v1573_v33  ;;  %v2242_v35 = vpop.f32.mrb[70].mxu0 }
 0x334   : > { %v1585_v37 = vadd.f32 %v2242_v35, %v1834_v49  ;;  %v1576_v57 = vpop.f32.mrb[71].mxu0  ;;  %v1602_v38 = vmax.f32 %v1582_v32, 0.0 }
 0x335   : > { %v1577_v5 = vadd.f32 %v1834_v49, %v1576_v57  ;;  %v1600_v58 = vmax.f32 %v1574_v34, 0.0 }
 0x336   : > { %v1603_v41 = vmax.f32 %v1585_v37, 0.0 }
 0x337   : > { %v1601_v42 = vmax.f32 %v1577_v5, 0.0 }
 0x338   : > { %v1919_v7 = vpack.c.bf16 %v1603_v41, %v1602_v38 }
 0x339   : > { %v1914_v43 = vpack.c.bf16 %v1601_v42, %v1600_v58 }
 0x33a   : > { %1927 = vst [vmem:[%s2910_s7 + $0x38] sm:$0xff] %v1919_v7  }
 0x33b   : > { %1926 = vst [vmem:[%s2910_s7 + $0x30] sm:$0xff] %v1914_v43  }
 0x33c   : > { %2379 = shalt.err (!%p2376_p3)
}
 0x33d   : > { %s2380_s17 = scalar_lea.hbm %s2923_s12, 1024  ;;  %s2384_s25 = scalar_lea.hbm %s2977_s5, 2048 }
 0x33e   : > { %p2381_p4 = scmp.ne.s32.totalorder %s2923_s12, %s2380_s17  ;;  %p2385_p9 = scmp.lt.u32.totalorder %s2923_s12, %s2977_s5 }
 0x33f   : > { %p2386_p10 = scmp.lt.u32.totalorder %s2384_s25, %s2380_s17  ;;  %p2388_p12 = scmp.lt.u32.totalorder %s2380_s17, %s2923_s12 }
 0x340   : > { %p2382_p7 = pnand %p2381_p4, %p2501_p5 }
 0x341   : > { %p2387_p11 = por %p2386_p10, %p2385_p9 }
 0x342   : > { %p2383_p8 = pneg %p2382_p7 }
 0x343   : > { %p2389_p13 = por %p2388_p12, %p2387_p11 }
 0x345   : > { %p2390_p0 = pnand %p2389_p13, %p2383_p8 }
 0x347   : > { %2393 = shalt.err (!%p2390_p0)
}
 0x348   : > { %s2431_s7 = smov 64   ;;  %s2432_s8 = smov 4  }
 0x349   : > { %2260 = dma.vmem_to_hbm [thread:$0]  (%p2501_p5), %s2925_s9, 1024, %s2923_s12, %s2931_s22, %s2431_s7, %s2431_s7, %s2432_s8  }
 0x34a PF: > { %p2266_p1 = scmp.ge.s32.totalorder %s2428_s21, 2  ;;  %s1713_s10 = sand.u32 1, %s2416_s18  }
 0x34b   : > { %s1714_s11 = scalar_lea.sflag [#allocation3], %s1713_s10 }
 0x34c   : > { %p2263_p2 = pnand %p2266_p1, %p2505_p6 }
 0x34e   : > { %2411 = dma.done.wait (!%p2263_p2), %s1714_s11, 1024  }
 0x34f   : > { %2413 = vsyncadd (!%p2263_p2), %s1714_s11, 4294966272  ;;  %p15_p3 = scmp.ge.s32.totalorder %s2488_s24, 4   ;;  %s2980_s18 = smov %s2420_s19 }
 0x350   : > { %s2981_s19 = smov %s2424_s20  ;;  %s2982_s20 = smov %s2499_s27 }
 0x351   : > { %s2983_s21 = smov %s2488_s24  ;;  %17 = sbr.rel (!%p15_p3) target bundleno = 3 (0x3), region = 75 }
 0x358   :  { %1719 = vsyncpa [#allocation3], 1 }
 0x359   :  { %1721 = vsyncpa [#allocation3 + $0x1], 1 }

</bundles_post_ra>
